<compile_context>
chip_gen: v7x
topology: tpu7x:2x2x1
jax: 0.10.0
libtpu: 0.0.40
codegen_flags: <defaults>
</compile_context>

<pallas_src>
import math

import jax
import jax.numpy as jnp
from jax.experimental import pallas as pl
from jax.experimental.pallas import tpu as pltpu

_SQRT_2_OVER_PI = math.sqrt(2.0 / math.pi)


def _gelu_math(x_f32):
    # x + x^3 == x * (1 + x*x)  (mathematically identical, one fewer mul)
    inner = jnp.float32(_SQRT_2_OVER_PI) * (x_f32 * (1.0 + x_f32 * x_f32))
    th = jnp.tanh(inner)                 # EUP
    return x_f32 * (0.5 + 0.5 * th)      # folded 0.5


def _gelu_kernel(x_ref, o_ref):
    # Upcast once; math in f32 so bf16 inputs are exact/fast even on v5e (no bf16 VPU/EUP).
    x = x_ref[...].astype(jnp.float32)
    o_ref[...] = _gelu_math(x).astype(o_ref.dtype)


def _largest_lane_width(total: int, cap: int) -> int:
    """Largest multiple of 128 that divides `total`, up to `cap`. 0 if none."""
    w = (min(cap, total) // 128) * 128
    while w >= 128:
        if total % w == 0:
            return w
        w -= 128
    return 0


def gelu_pallas(
    x: jax.Array,
    *,
    target_block_bytes: int = 4 << 20,   # ~4 MiB tiles -> ~16 MiB VMEM double-buffered in+out
    max_lane_width: int = 2048,          # lane-dense last dim (multiple of 128)
    min_pallas_bytes: int = 256 * 1024,  # below this, plain fused XLA elementwise is faster
) -> jax.Array:
    """Elementwise GELU variant (x + x**3, no 0.044715). Streams a lane-dense 2D slab."""
    orig_shape = x.shape
    dtype = x.dtype
    total = x.size
    if total == 0:
        return x
    itemsize = jnp.dtype(dtype).itemsize

    # ---- small-input fast path: launch + layout plumbing dominates for tiny tensors ----
    if total * itemsize <= min_pallas_bytes:
        return _gelu_math(x.astype(jnp.float32)).astype(dtype)

    xf = x.reshape(-1)

    # ---- adaptive lane width: avoid pad/slice (2 extra full-tensor HBM passes) ----
    lane_width = _largest_lane_width(total, max_lane_width)
    pad = 0
    if lane_width == 0:
        # Rare fallback: total is not a multiple of 128. Minimal zero-pad; GELU(0)==0
        # and the padded tail is sliced off, so this is numerically safe.
        lane_width = 128
        padded_total = pl.cdiv(total, lane_width) * lane_width
        pad = padded_total - total
        xf = jnp.pad(xf, (0, pad))
    else:
        padded_total = total

    rows = padded_total // lane_width
    x2d = xf.reshape(rows, lane_width)

    # ---- block rows: ~target_block_bytes, multiple of 32 sublanes (covers f32/bf16/int8) ----
    block_rows = max(32, (target_block_bytes // (lane_width * itemsize)) // 32 * 32)
    if rows >= 64:
        # Keep >= 2 grid steps so the parallel axis can shard across v7x's 2 TensorCores.
        half = max(32, (rows // 2) // 32 * 32)
        block_rows = min(block_rows, half)
    if block_rows >= rows:
        # Small/odd input: single whole-array block (block dims == array dims is legal).
        block_rows = rows

    grid = (pl.cdiv(rows, block_rows),)

    # Explicit VMEM limit: 2 arrays x 2 buffers x block + headroom. Raises v5e's 16 MiB
    # scoped default when needed; stays well under v7x's 64 MiB physical.
    block_bytes = block_rows * lane_width * itemsize
    vmem_limit = min(2 * 2 * block_bytes + (8 << 20), 64 << 20)

    out2d = pl.pallas_call(
        _gelu_kernel,
        out_shape=jax.ShapeDtypeStruct((rows, lane_width), dtype),
        grid_spec=pltpu.PrefetchScalarGridSpec(
            num_scalar_prefetch=0,
            grid=grid,
            in_specs=[pl.BlockSpec((block_rows, lane_width), lambda i: (i, 0))],
            out_specs=pl.BlockSpec((block_rows, lane_width), lambda i: (i, 0)),
        ),
        compiler_params=pltpu.CompilerParams(
            dimension_semantics=("parallel",),
            vmem_limit_bytes=vmem_limit,
        ),
    )(x2d)

    out = out2d.reshape(-1)
    if pad:
        out = out[:total]
    return out.reshape(orig_shape)


def gelu_ref(x: jax.Array) -> jax.Array:
    xf = x.astype(jnp.float32)
    a = jnp.float32(_SQRT_2_OVER_PI)
    th = jnp.tanh(a * (xf + xf ** 3))
    return (0.5 * xf * (1.0 + th)).astype(x.dtype)


if __name__ == "__main__":
    key = jax.random.PRNGKey(0)

    # 1) Module-consistent small shape (batch=2, seq=8, hidden=32) -> small-input fast path.
    x_small = jax.random.normal(key, (2, 8, 32), dtype=jnp.float32)
    y_small = gelu_pallas(x_small)
    jax.block_until_ready(y_small)
    assert y_small.shape == x_small.shape and y_small.dtype == x_small.dtype
    assert jnp.allclose(y_small, gelu_ref(x_small), atol=1e-5, rtol=1e-5), "mismatch (fast path)"

    # 2) Same small shape forced through the Pallas kernel (single whole-array block, lane_width=512).
    y_small_k = gelu_pallas(x_small, min_pallas_bytes=0)
    jax.block_until_ready(y_small_k)
    assert jnp.allclose(y_small_k, gelu_ref(x_small), atol=1e-5, rtol=1e-5), "mismatch (kernel, small)"

    # 3) Non-128-multiple total forced through the kernel -> rare padded fallback path.
    x_odd = jax.random.normal(jax.random.PRNGKey(0), (3, 5, 33), dtype=jnp.float32)
    y_odd = gelu_pallas(x_odd, min_pallas_bytes=0)
    jax.block_until_ready(y_odd)
    assert jnp.allclose(y_odd, gelu_ref(x_odd), atol=1e-5, rtol=1e-5), "mismatch (kernel, padded)"

    # 4) Multi-block tiled path: adaptive lane width, no padding, grid >= 2 steps.
    x_big = jax.random.normal(jax.random.PRNGKey(0), (8, 128, 256), dtype=jnp.float32)
    y_big = gelu_pallas(x_big)
    jax.block_until_ready(y_big)
    assert jnp.allclose(y_big, gelu_ref(x_big), atol=1e-5, rtol=1e-5), "mismatch (kernel, tiled)"

    print("KERNEL_OK")
</pallas_src>

<mosaic_0001>
module attributes {stable_mosaic.version = 11 : i64} {
  func.func @_gelu_kernel(%arg0: i32, %arg1: memref<1x512xf32, #tpu.memory_space<vmem>>, %arg2: memref<1x512xf32, #tpu.memory_space<vmem>>) attributes {dimension_semantics = [#tpu.dimension_semantics<parallel>], iteration_bounds = array<i64: 1>, scalar_prefetch = 0 : i64, scratch_operands = 0 : i64, tpu.core_type = #tpu.core_type<tc>, window_params = [{transform_indices = @transform_0, window_bounds = array<i64: 1, 512>}, {transform_indices = @transform_1, window_bounds = array<i64: 1, 512>}]} {
    %c0 = arith.constant 0 : index
    %c0_0 = arith.constant 0 : index
    %0 = vector.load %arg1[%c0, %c0_0] : memref<1x512xf32, #tpu.memory_space<vmem>>, vector<1x512xf32>
    %1 = arith.mulf %0, %0 : vector<1x512xf32>
    %cst = arith.constant 1.000000e+00 : f32
    %2 = vector.broadcast %cst : f32 to vector<1x512xf32>
    %3 = arith.addf %2, %1 : vector<1x512xf32>
    %4 = arith.mulf %0, %3 : vector<1x512xf32>
    %cst_1 = arith.constant 0.797884583 : f32
    %5 = vector.broadcast %cst_1 : f32 to vector<1x512xf32>
    %6 = arith.mulf %5, %4 : vector<1x512xf32>
    %7 = math.tanh %6 : vector<1x512xf32>
    %cst_2 = arith.constant 5.000000e-01 : f32
    %8 = vector.broadcast %cst_2 : f32 to vector<1x512xf32>
    %9 = arith.mulf %8, %7 : vector<1x512xf32>
    %cst_3 = arith.constant 5.000000e-01 : f32
    %10 = vector.broadcast %cst_3 : f32 to vector<1x512xf32>
    %11 = arith.addf %10, %9 : vector<1x512xf32>
    %12 = arith.mulf %0, %11 : vector<1x512xf32>
    %c0_4 = arith.constant 0 : index
    %c0_5 = arith.constant 0 : index
    %13 = vector.load %arg2[%c0_4, %c0_5] : memref<1x512xf32, #tpu.memory_space<vmem>>, vector<1x512xf32>
    tpu.vector_store %arg2[%c0_4, %c0_5], %12 {strides = array<i32>} : memref<1x512xf32, #tpu.memory_space<vmem>>, vector<1x512xf32>,
    return
  }
  func.func @transform_0(%arg0: i32) -> (i32, i32) {
    %c0_i32 = arith.constant 0 : i32
    %c0_i32_0 = arith.constant 0 : i32
    return %arg0, %c0_i32 : i32, i32
  }
  func.func @transform_1(%arg0: i32) -> (i32, i32) {
    %c0_i32 = arith.constant 0 : i32
    %c0_i32_0 = arith.constant 0 : i32
    return %arg0, %c0_i32 : i32, i32
  }
}

</mosaic_0001>

<bundles_post_ra>
// kernel: tpu_custom_call.1
= control target key start
LH: loop header
LB: loop body
LE: loop exit
PB: predicated region body
PF: predicated region fallthrough
CT: control target
= control target key end

     0   :  { %6 = vsyncpa [#allocation3], 0  ;;  %s138_s0 = inlined_call_operand.hbm [shape: f32[1,512], index: 0, kind: input, shape index: {}]   ;;  %s139_s1 = inlined_call_operand.hbm [shape: f32[1,512], index: 1, kind: output, shape index: {}]  }
   0x1   :  { %7 = vsyncpa [#allocation4], 0  ;;  %s102_s6 = smov [#allocation2]   ;;  %s54_s10 = scalar_lea.hbm %s138_s0, 64 }
   0x2   :  { %s14_s7 = sshll.u32 %s102_s6, 4  ;;  %p55_p0 = scmp.ne.s32.totalorder %s138_s0, %s54_s10  ;;  %s15_s7 = int_to_ptr.vmem [resolvable:$true] %s14_s7 }
   0x3   :  { %p58_p1 = scmp.lt.u32.totalorder %s54_s10, %s138_s0 }
   0x5   :  { %p60_p2 = pnand %p58_p1, %p55_p0 }
   0x7   :  { %63 = shalt.err (!%p60_p2)
}
   0x8   :  { %s64_s15 = scalar_lea.vmem %s15_s7, 64  ;;  %p69_p4 = scmp.lt.s32.totalorder %s15_s7, %s15_s7 }
   0x9   :  { %p65_p3 = scmp.ne.s32.totalorder %s15_s7, %s64_s15  ;;  %p70_p5 = scmp.lt.s32.totalorder %s64_s15, %s64_s15 }
   0xb   :  { %p71_p6 = por %p70_p5, %p69_p4 }
   0xd   :  { %p72_p7 = pnand %p71_p6, %p65_p3 }
   0xf   :  { %75 = shalt.err (!%p72_p7)
}
  0x10   :  { %17 = dma.hbm_to_vmem [thread:$0]  %s138_s0, 64, %s15_s7, [#allocation3]  }
  0x11   :  { %98 = dma.done.wait [#allocation3], 64  }
  0x12   :  { %99 = vsyncadd [#allocation3], 4294967232  ;;  %v21_v0 = vld [vmem:[#allocation2] sm:$0xf]  ;;  %v30_v6 = vlaneseq  ;;  %s103_s18 = smov [#allocation5]  }
  0x13   :  { %v22_v1 = vmul.f32 %v21_v0, %v21_v0  ;;  %s41_s19 = sshll.u32 %s103_s18, 4  ;;  %s42_s19 = int_to_ptr.vmem [resolvable:$true] %s41_s19 }
  0x14   :  { %vm32_vm0 = vcmp.lt.s32.totalorder %v30_v6, 512  ;;  %s76_s20 = scalar_lea.vmem %s42_s19, 64  ;;  %p81_p9 = scmp.lt.s32.totalorder %s42_s19, %s42_s19 }
  0x15   :  { %v23_v2 = vadd.f32 1.0, %v22_v1  ;;  %p77_p8 = scmp.ne.s32.totalorder %s42_s19, %s76_s20  ;;  %p82_p10 = scmp.lt.s32.totalorder %s76_s20, %s76_s20 }
  0x17   :  { %v24_v3 = vmul.f32 %v23_v2, %v21_v0  ;;  %p83_p11 = por %p82_p10, %p81_p9 }
  0x19   :  { %v25_v4 = vmul.f32 0.7978846, %v24_v3  ;;  %p84_p12 = pnand %p83_p11, %p77_p8 }
  0x1b   :  { %52 = vtanh.f32 %v25_v4 }
  0x25   :  { %v53_v5 = vpop.eup %52 }
  0x26   :  { %v27_v7 = vmul.f32 0.5, %v53_v5 }
  0x28   :  { %v28_v8 = vadd.f32 0.5, %v27_v7 }
  0x2a   :  { %v29_v9 = vmul.f32 %v28_v8, %v21_v0 }
  0x2c   :  { %34 = vst.msk [vmem:[#allocation5] sm:$0xf] %vm32_vm0, %v29_v9 }
  0x2d   :  { %87 = shalt.err (!%p84_p12)
}
  0x2e   :  { %s88_s22 = scalar_lea.hbm %s139_s1, 64 }
  0x2f   :  { %p89_p13 = scmp.ne.s32.totalorder %s139_s1, %s88_s22  ;;  %p92_p0 = scmp.lt.u32.totalorder %s88_s22, %s139_s1 }
  0x31   :  { %p94_p1 = pnand %p92_p0, %p89_p13 }
  0x33   :  { %97 = shalt.err (!%p94_p1)
}
  0x34   :  { %44 = dma.vmem_to_hbm [thread:$0]  %s42_s19, 64, %s139_s1, [#allocation4]  }
  0x35   :  { %100 = dma.done.wait [#allocation4], 64  }
  0x36   :  { %101 = vsyncadd [#allocation4], 4294967232 }
  0x37   :  { %48 = vsyncpa [#allocation3], 1 }
  0x38   :  { %49 = vsyncpa [#allocation4], 1 }

</bundles_post_ra>
